<compile_context>
chip_gen: v5e
topology: v5e:2x2
jax: 0.10.0
libtpu: 0.0.40
codegen_flags: <defaults>
</compile_context>

<pallas_src>
import functools

import jax
import jax.numpy as jnp
from jax.experimental import pallas as pl
from jax.experimental.pallas import tpu as pltpu


def _round_up(x, m):
    return ((x + m - 1) // m) * m


def _cdiv(a, b):
    return -(-a // b)


def _vmem_capacity_bytes():
    """Physical VMEM per TensorCore; falls back to the smallest (v7x, 64 MiB)."""
    try:
        info = pltpu.get_tpu_info()
        cap = getattr(info, "vmem_capacity_bytes", None)
        if cap:
            return int(cap)
    except Exception:
        pass
    return 64 * 1024 * 1024


def _default_num_shards():
    """One partial sum per TensorCore: 2 on v7x, 1 on single-TC v5e/v6e."""
    try:
        kind = jax.devices()[0].device_kind.lower()
        if "v7" in kind:
            return 2
    except Exception:
        pass
    return 1


def _per_row_vmem_bytes(c, itemsize):
    # Double-buffered logits tile (input dtype) + ~4 f32 working copies of the
    # tile (shifted / exp / weights / product; the lane dim pads to 128, which
    # also covers the (TN, 1) column temps) + double-buffered int32 targets.
    lane_c = max(c, 128)
    return 2 * c * itemsize + 4 * lane_c * 4 + 2 * 4


def _auto_batch_tile(n, c, itemsize, vmem_cap, num_shards):
    per_row = _per_row_vmem_bytes(c, itemsize)
    budget = vmem_cap // 2                       # leave half for regalloc/slack
    bt = max(8, (budget // per_row) // 8 * 8)    # byte-capped, no row cap
    # Never pad a small batch beyond what one shard needs.
    need = _round_up(_cdiv(n, max(1, num_shards)), 8)
    return int(min(bt, need))
    # TODO(synk): if C is so large that even 8 rows exceed the budget, the
    # class dim would need tiling (two-pass LSE); not implemented here.


def _ce_ls_kernel(x_ref, y_ref, out_ref, acc_ref, *,
                  epsilon, num_classes, n_rows, inv_n, batch_tile, has_padding):
    """Per-(shard, batch-tile) step.

    x_ref   : (TN, C)  logits tile (VMEM), f32 or bf16
    y_ref   : (TN, 1)  int32 labels tile (VMEM)
    out_ref : (1, 1)   per-shard partial loss (SMEM)
    acc_ref : (1,)     f32 running sum for this shard (SMEM scratch)
    """
    shard = pl.program_id(0)
    tile = pl.program_id(1)
    n_tiles = pl.num_programs(1)

    @pl.when(tile == 0)
    def _():
        acc_ref[0] = jnp.float32(0.0)

    x = x_ref[...].astype(jnp.float32)                          # (TN, C)
    # numerically stable log-sum-exp along the class (lane) axis
    m = jnp.max(x, axis=-1, keepdims=True)                      # (TN, 1)
    shifted = x - m                                             # (TN, C)
    lse = jnp.log(jnp.sum(jnp.exp(shifted), axis=-1, keepdims=True))  # (TN, 1)

    # Fused smoothed-target reduction:
    #   row_loss = -sum_c t_c*(shifted_c - lse) = lse - sum_c w_c*shifted_c
    #   w_c = eps/C + (1-eps)*[c == y]         (since sum_c t_c == 1)
    labels = y_ref[...]                                         # (TN, 1) int32
    cols = jax.lax.broadcasted_iota(jnp.int32, (1, shifted.shape[-1]), 1)
    smooth_w = jnp.float32(epsilon / num_classes)
    hit_w = jnp.float32(1.0 - epsilon + epsilon / num_classes)
    w = jnp.where(cols == labels, hit_w, smooth_w)              # (TN, C)
    wsum = jnp.sum(w * shifted, axis=-1, keepdims=True)         # (TN, 1)
    row_loss = lse - wsum                                       # (TN, 1)

    if has_padding:
        tile_start = (shard * n_tiles + tile) * batch_tile
        tile_is_padded = tile_start + batch_tile > n_rows

        @pl.when(tile_is_padded)
        def _():
            rows = (jax.lax.broadcasted_iota(jnp.int32, row_loss.shape, 0)
                    + tile_start)
            acc_ref[0] += jnp.sum(jnp.where(rows < n_rows, row_loss, 0.0))

        @pl.when(jnp.logical_not(tile_is_padded))
        def _():
            acc_ref[0] += jnp.sum(row_loss)
    else:
        acc_ref[0] += jnp.sum(row_loss)

    @pl.when(tile == n_tiles - 1)
    def _():
        out_ref[0, 0] = acc_ref[0] * jnp.float32(inv_n)


def cross_entropy_label_smoothing(inputs, targets, *, num_classes, epsilon,
                                  batch_tile=None, num_shards=None):
    """inputs: (N, C) float logits (f32 or bf16); targets: (N,) int labels.

    Returns the scalar f32 loss of the PyTorch module.
    NOTE: out-of-range labels silently get zero "hit" weight instead of
    erroring like torch.scatter_; padded rows are masked out.
    """
    n, c = inputs.shape
    assert c == num_classes

    if num_shards is None:
        num_shards = _default_num_shards()

    vmem_cap = _vmem_capacity_bytes()
    itemsize = jnp.dtype(inputs.dtype).itemsize
    if batch_tile is None:
        batch_tile = _auto_batch_tile(n, c, itemsize, vmem_cap, num_shards)
    assert batch_tile % 8 == 0, "batch_tile must be a multiple of 8 (sublane)"

    tiles_total = _cdiv(n, batch_tile)
    num_shards = int(max(1, min(num_shards, tiles_total)))
    tiles_per_shard = _cdiv(tiles_total, num_shards)
    padded_n = num_shards * tiles_per_shard * batch_tile

    targets2d = targets.astype(jnp.int32).reshape(n, 1)
    if padded_n != n:
        inputs = jnp.pad(inputs, ((0, padded_n - n), (0, 0)))
        targets2d = jnp.pad(targets2d, ((0, padded_n - n), (0, 0)))

    kernel = functools.partial(
        _ce_ls_kernel,
        epsilon=float(epsilon),
        num_classes=int(num_classes),
        n_rows=int(n),
        inv_n=1.0 / float(n),
        batch_tile=int(batch_tile),
        has_padding=(padded_n != n),
    )

    # Scoped-VMEM limit from the actual footprint (f32 upcast temps included),
    # capped safely below physical capacity per generation.
    footprint = _per_row_vmem_bytes(c, itemsize) * batch_tile + (2 << 20)
    vmem_limit = int(min(max(footprint, 32 * 1024 * 1024), vmem_cap * 3 // 4))

    tps = tiles_per_shard
    data_map = lambda s, t: (s * tps + t, 0)

    partials = pl.pallas_call(
        kernel,
        out_shape=jax.ShapeDtypeStruct((num_shards, 1), jnp.float32),
        grid_spec=pltpu.PrefetchScalarGridSpec(
            num_scalar_prefetch=0,
            grid=(num_shards, tiles_per_shard),
            in_specs=[
                pl.BlockSpec((batch_tile, c), data_map),
                pl.BlockSpec((batch_tile, 1), data_map),
            ],
            out_specs=pl.BlockSpec((1, 1), lambda s, t: (s, 0),
                                   memory_space=pltpu.SMEM),
            scratch_shapes=[pltpu.SMEM((1,), jnp.float32)],
        ),
        compiler_params=pltpu.CompilerParams(
            # TODO(synk): on v7x, verify with xprof that the "parallel" shard
            # axis actually lands on both TensorCores; if not, switch axis 0 to
            # pltpu.CORE_PARALLEL.  If DMA is still exposed per step there,
            # consider pipeline_mode=pl.Buffered(3) on the logits BlockSpec.
            dimension_semantics=("parallel", "arbitrary"),
            vmem_limit_bytes=vmem_limit,
        ),
    )(inputs, targets2d)

    # sum per-shard partials (each already scaled by 1/N)
    return jnp.sum(partials)


def _reference(inputs, targets, num_classes, epsilon):
    log_probs = jax.nn.log_softmax(inputs.astype(jnp.float32), axis=1)
    onehot = jax.nn.one_hot(targets, num_classes, dtype=jnp.float32)
    t = (1.0 - epsilon) * onehot + epsilon / num_classes
    return (-t * log_probs).mean(0).sum()


if __name__ == "__main__":
    num_classes = 32
    epsilon = 0.1

    key = jax.random.PRNGKey(0)
    k_x, k_y = jax.random.split(key)

    n = 16
    inputs = jax.random.normal(k_x, (n, num_classes), dtype=jnp.float32)
    targets = jax.random.randint(k_y, (n,), 0, num_classes, dtype=jnp.int32)
    ref = _reference(inputs, targets, num_classes, epsilon)

    # 1) auto-tiled default path (generation-aware shards + tile size)
    loss = cross_entropy_label_smoothing(
        inputs, targets, num_classes=num_classes, epsilon=epsilon)
    loss = jax.block_until_ready(loss)
    assert jnp.allclose(loss, ref, rtol=1e-5, atol=1e-5), (loss, ref)

    # 2) multi-tile sequential accumulation path (grid = (1, 2))
    loss2 = cross_entropy_label_smoothing(
        inputs, targets, num_classes=num_classes, epsilon=epsilon,
        batch_tile=8, num_shards=1)
    loss2 = jax.block_until_ready(loss2)
    assert jnp.allclose(loss2, ref, rtol=1e-5, atol=1e-5), (loss2, ref)

    # 3) two-shard "parallel" axis path (grid = (2, 1))
    loss3 = cross_entropy_label_smoothing(
        inputs, targets, num_classes=num_classes, epsilon=epsilon,
        batch_tile=8, num_shards=2)
    loss3 = jax.block_until_ready(loss3)
    assert jnp.allclose(loss3, ref, rtol=1e-5, atol=1e-5), (loss3, ref)

    # 4) non-multiple-of-8 batch exercises the pl.when-gated padded-row mask
    n4 = 13
    inputs4 = jax.random.normal(k_x, (n4, num_classes), dtype=jnp.float32)
    targets4 = jax.random.randint(k_y, (n4,), 0, num_classes, dtype=jnp.int32)
    ref4 = _reference(inputs4, targets4, num_classes, epsilon)
    loss4 = cross_entropy_label_smoothing(
        inputs4, targets4, num_classes=num_classes, epsilon=epsilon,
        batch_tile=8, num_shards=1)
    loss4 = jax.block_until_ready(loss4)
    assert jnp.allclose(loss4, ref4, rtol=1e-5, atol=1e-5), (loss4, ref4)

    # 5) bf16 logits (halves HBM traffic; kernel upcasts to f32)
    inputs_bf16 = inputs.astype(jnp.bfloat16)
    ref_bf16 = _reference(inputs_bf16.astype(jnp.float32), targets,
                          num_classes, epsilon)
    loss5 = cross_entropy_label_smoothing(
        inputs_bf16, targets, num_classes=num_classes, epsilon=epsilon)
    loss5 = jax.block_until_ready(loss5)
    assert jnp.allclose(loss5, ref_bf16, rtol=1e-4, atol=1e-4), (loss5, ref_bf16)

    print("KERNEL_OK")
</pallas_src>

<mosaic_0001>
module attributes {stable_mosaic.version = 11 : i64} {
  func.func @_ce_ls_kernel(%arg0: i32, %arg1: i32, %arg2: memref<16x32xf32, #tpu.memory_space<vmem>>, %arg3: memref<16x1xi32, #tpu.memory_space<vmem>>, %arg4: memref<1x1xf32, #tpu.memory_space<smem>>, %arg5: memref<1xf32, #tpu.memory_space<smem>>) attributes {dimension_semantics = [#tpu.dimension_semantics<parallel>, #tpu.dimension_semantics<arbitrary>], iteration_bounds = array<i64: 1, 1>, scalar_prefetch = 0 : i64, scratch_operands = 1 : i64, tpu.core_type = #tpu.core_type<tc>, window_params = [{transform_indices = @transform_0, window_bounds = array<i64: 16, 32>}, {transform_indices = @transform_1, window_bounds = array<i64: 16, 1>}, {transform_indices = @transform_2, window_bounds = array<i64: 1, 1>}]} {
    %c0_i32 = arith.constant 0 : i32
    %0 = arith.cmpi eq, %arg1, %c0_i32 : i32
    %1 = arith.extui %0 : i1 to i32
    %c0_i32_0 = arith.constant 0 : i32
    %2 = arith.cmpi ne, %1, %c0_i32_0 : i32
    scf.if %2 {
      %cst_13 = arith.constant 0.000000e+00 : f32
      %c0_14 = arith.constant 0 : index
      %34 = memref.load %arg5[%c0_14] : memref<1xf32, #tpu.memory_space<smem>>
      memref.store %cst_13, %arg5[%c0_14] : memref<1xf32, #tpu.memory_space<smem>>
    } else {
    }
    %c0 = arith.constant 0 : index
    %c0_1 = arith.constant 0 : index
    %3 = vector.load %arg2[%c0, %c0_1] : memref<16x32xf32, #tpu.memory_space<vmem>>, vector<16x32xf32>
    %cst = arith.constant dense<0xFF800000> : vector<16xf32>
    %4 = vector.multi_reduction <maximumf>, %3, %cst [1] : vector<16x32xf32> to vector<16xf32>
    %5 = vector.shape_cast %4 : vector<16xf32> to vector<16x1xf32>
    %6 = vector.broadcast %5 : vector<16x1xf32> to vector<16x32xf32>
    %7 = arith.subf %3, %6 : vector<16x32xf32>
    %8 = math.exp %7 : vector<16x32xf32>
    %cst_2 = arith.constant dense<0.000000e+00> : vector<16xf32>
    %9 = vector.multi_reduction <add>, %8, %cst_2 [1] : vector<16x32xf32> to vector<16xf32>
    %10 = vector.shape_cast %9 : vector<16xf32> to vector<16x1xf32>
    %11 = math.log %10 : vector<16x1xf32>
    %c0_3 = arith.constant 0 : index
    %c0_4 = arith.constant 0 : index
    %12 = vector.load %arg3[%c0_3, %c0_4] : memref<16x1xi32, #tpu.memory_space<vmem>>, vector<16x1xi32>
    %13 = tpu.iota {dimensions = array<i32: 1>} : vector<1x32xi32>
    %14 = vector.broadcast %13 : vector<1x32xi32> to vector<16x32xi32>
    %15 = vector.broadcast %12 : vector<16x1xi32> to vector<16x32xi32>
    %16 = arith.cmpi eq, %14, %15 : vector<16x32xi32>
    %cst_5 = arith.constant 0.903124988 : f32
    %cst_6 = arith.constant 3.125000e-03 : f32
    %17 = vector.broadcast %cst_5 : f32 to vector<16x32xf32>
    %18 = vector.broadcast %cst_6 : f32 to vector<16x32xf32>
    %19 = arith.select %16, %17, %18 : vector<16x32xi1>, vector<16x32xf32>
    %20 = arith.mulf %19, %7 : vector<16x32xf32>
    %cst_7 = arith.constant dense<0.000000e+00> : vector<16xf32>
    %21 = vector.multi_reduction <add>, %20, %cst_7 [1] : vector<16x32xf32> to vector<16xf32>
    %22 = vector.shape_cast %21 : vector<16xf32> to vector<16x1xf32>
    %23 = arith.subf %11, %22 : vector<16x1xf32>
    %c0_8 = arith.constant 0 : index
    %24 = memref.load %arg5[%c0_8] : memref<1xf32, #tpu.memory_space<smem>>
    %25 = vector.shape_cast %23 : vector<16x1xf32> to vector<1x16x1xf32>
    %cst_9 = arith.constant dense<0.000000e+00> : vector<1xf32>
    %26 = vector.multi_reduction <add>, %25, %cst_9 [1, 2] : vector<1x16x1xf32> to vector<1xf32>
    %27 = vector.shape_cast %26 : vector<1xf32> to vector<1x1x1xf32>
    %28 = vector.extract %27[0, 0, 0] : f32 from vector<1x1x1xf32>
    %29 = arith.addf %24, %28 : f32
    %c0_10 = arith.constant 0 : index
    %30 = memref.load %arg5[%c0_10] : memref<1xf32, #tpu.memory_space<smem>>
    memref.store %29, %arg5[%c0_10] : memref<1xf32, #tpu.memory_space<smem>>
    %c0_i32_11 = arith.constant 0 : i32
    %31 = arith.cmpi eq, %arg1, %c0_i32_11 : i32
    %32 = arith.extui %31 : i1 to i32
    %c0_i32_12 = arith.constant 0 : i32
    %33 = arith.cmpi ne, %32, %c0_i32_12 : i32
    scf.if %33 {
      %c0_13 = arith.constant 0 : index
      %34 = memref.load %arg5[%c0_13] : memref<1xf32, #tpu.memory_space<smem>>
      %cst_14 = arith.constant 6.250000e-02 : f32
      %35 = arith.mulf %34, %cst_14 : f32
      %c0_15 = arith.constant 0 : index
      %c0_16 = arith.constant 0 : index
      %36 = memref.load %arg4[%c0_15, %c0_16] : memref<1x1xf32, #tpu.memory_space<smem>>
      memref.store %35, %arg4[%c0_15, %c0_16] : memref<1x1xf32, #tpu.memory_space<smem>>
    } else {
    }
    return
  }
  func.func @transform_0(%arg0: i32, %arg1: i32) -> (i32, i32) {
    %c1_i32 = arith.constant 1 : i32
    %0 = arith.muli %arg0, %c1_i32 : i32
    %1 = arith.addi %0, %arg1 : i32
    %c0_i32 = arith.constant 0 : i32
    %c0_i32_0 = arith.constant 0 : i32
    return %1, %c0_i32 : i32, i32
  }
  func.func @transform_1(%arg0: i32, %arg1: i32) -> (i32, i32) {
    %c1_i32 = arith.constant 1 : i32
    %0 = arith.muli %arg0, %c1_i32 : i32
    %1 = arith.addi %0, %arg1 : i32
    %c0_i32 = arith.constant 0 : i32
    %c0_i32_0 = arith.constant 0 : i32
    return %1, %c0_i32 : i32, i32
  }
  func.func @transform_2(%arg0: i32, %arg1: i32) -> (i32, i32) {
    %c0_i32 = arith.constant 0 : i32
    %c0_i32_0 = arith.constant 0 : i32
    return %arg0, %c0_i32 : i32, i32
  }
}

</mosaic_0001>

<bundles_post_ra>
// kernel: tpu_custom_call.1
= control target key start
LH: loop header
LB: loop body
LE: loop exit
PB: predicated region body
PF: predicated region fallthrough
CT: control target
= control target key end

     0   :  { %vm64_vm0 = vcmask 261120   ;;  %v191_v2 = vmov 0   ;;  %s230_s0 = inlined_call_operand.vmem [shape: f32[16,32], index: 0, kind: input, shape index: {}]   ;;  %s231_s1 = inlined_call_operand.vmem [shape: s32[16,1], index: 1, kind: input, shape index: {}]   ;;  %s232_s2 = inlined_call_operand.hbm [shape: f32[1,1], index: 2, kind: output, shape index: {}]  }
   0x1   :  { %v62_v0 = vld [vmem:[%s230_s0] sm:$0xff]  ;;  %167 = vset.pattern.permute.xlu1 %v191_v2  ;;  %168 = vset.pattern.permute.xlu0 %v191_v2 }
   0x2   :  { %v87_v1 = vld [vmem:[%s231_s1] sm:$0xff]  ;;  %v65_v3 = vsel %vm64_vm0, %v62_v0, -inf }
   0x3   :  { %66 = vmax.xlane.f32.xlu0 %v65_v3  ;;  %92 = vperm.xlu1 %167, %v87_v1  }
   0x4   :  { %7 = vsyncpa [#allocation4], 0  ;;  %v63_v4 = vld [vmem:[%s230_s0 + $0x8] sm:$0xff]  ;;  %v89_v7 = vlaneseq  ;;  %v192_v11 = vmov 0.003125   ;;  %vm112_vm3 = vcmask 7168  }
   0x5   :  { %v68_v5 = vsel %vm64_vm0, %v63_v4, -inf  ;;  %v88_v6 = vld [vmem:[%s231_s1 + $0x8] sm:$0xff]  ;;  %s140_s17 = sshll.u32 %s232_s2, 4  ;;  %s193_s20 = smov [#allocation3]   ;;  %s141_s17 = int_to_ptr.hbm [resolvable:$true] %s140_s17 }
   0x6   :  { %v90_v8 = vand.u32 127, %v89_v7 }
   0xb   :  { %69 = vmax.xlane.f32.xlu0 %v68_v5  ;;  %95 = vperm.xlu1 %167, %v88_v6  }
  0x75   :  { %v93_v9 = vpop.permute.xlu1 %92 }
  0x76   :  { %vm97_vm1 = vcmp.eq.s32.totalorder %v90_v8, %v93_v9  ;;  %v67_v10 = vpop.xlane.xlu0 %66 }
  0x77   :  { %v99_v12 = vsel %vm97_vm1, 0.903125, %v192_v11  ;;  %v71_v13 = vsub.f32 %v62_v0, %v67_v10 }
  0x79   :  { %v73_v14 = vmul.f32 1.442695, %v71_v13  ;;  %v101_v15 = vmul.f32 %v99_v12, %v71_v13 }
  0x7b   :  { %169 = vpow2.f32 %v73_v14  ;;  %v103_v16 = vsel %vm64_vm0, %v101_v15, 0.0 }
  0x7c   :  { %104 = vadd.xlane.f32.xlu0 %v103_v16 }
  0x7d   :  { %v96_v17 = vpop.permute.xlu1 %95 }
  0x7e   :  { %vm98_vm2 = vcmp.eq.s32.totalorder %v90_v8, %v96_v17  ;;  %v70_v18 = vpop.xlane.xlu0 %69 }
  0x7f   :  { %v100_v19 = vsel %vm98_vm2, 0.903125, %v192_v11  ;;  %v72_v20 = vsub.f32 %v63_v4, %v70_v18 }
  0x81   :  { %v170_v21 = vpop.eup %169  ;;  %v75_v22 = vmul.f32 1.442695, %v72_v20  ;;  %v102_v23 = vmul.f32 %v100_v19, %v72_v20 }
  0x82   :  { %v77_v24 = vsel %vm64_vm0, %v170_v21, 0.0 }
  0x83   :  { %171 = vpow2.f32 %v75_v22  ;;  %78 = vadd.xlane.f32.xlu2 %v77_v24  ;;  %v106_v25 = vsel %vm64_vm0, %v102_v23, 0.0 }
  0x84   :  { %107 = vadd.xlane.f32.xlu1 %v106_v25 }
  0x89   :  { %v172_v26 = vpop.eup %171 }
  0x8a   :  { %v80_v27 = vsel %vm64_vm0, %v172_v26, 0.0 }
  0x8b   :  { %81 = vadd.xlane.f32.xlu2 %v80_v27 }
  0xef   :  { %v105_v33 = vpop.xlane.xlu0 %104 }
  0xf6   :  { %v79_v28 = vpop.xlane.xlu2 %78 }
  0xf7   :  { %173 = vlog2.f32 %v79_v28  ;;  %v108_v36 = vpop.xlane.xlu1 %107 }
  0xfd   :  { %v174_v30 = vpop.eup %173 }
  0xfe   :  { %v82_v29 = vpop.xlane.xlu2 %81  ;;  %v84_v31 = vmul.f32 0.6931472, %v174_v30 }
  0xff   :  { %175 = vlog2.f32 %v82_v29 }
 0x100   :  { %v109_v34 = vsub.f32 %v84_v31, %v105_v33 }
 0x102   :  { %v113_v38 = vsel %vm112_vm3, %v109_v34, 0.0 }
 0x105   :  { %v176_v32 = vpop.eup %175 }
 0x106   :  { %v86_v35 = vmul.f32 0.6931472, %v176_v32 }
 0x108   :  { %v110_v37 = vsub.f32 %v86_v35, %v108_v36 }
 0x10a   :  { %v114_v39 = vsel %vm112_vm3, %v110_v37, 0.0 }
 0x10b   :  { %v115_v40 = vadd.f32 %v114_v39, %v113_v38 }
 0x10d   :  { %116 = vadd.xlane.f32.xlu2 %v115_v40 }
 0x180   :  { %v117_v41 = vpop.xlane.xlu2 %116 }
 0x181   :  { %v118_v42 = vrot.slane %v117_v41, 4 }
 0x183   :  { %v119_v43 = vadd.f32 %v118_v42, %v117_v41 }
 0x185   :  { %v120_v44 = vrot.slane %v119_v43, 2 }
 0x187   :  { %v121_v45 = vadd.f32 %v120_v44, %v119_v43 }
 0x189   :  { %v122_v46 = vrot.slane %v121_v45, 1 }
 0x18b   :  { %v123_v47 = vadd.f32 %v122_v46, %v121_v45 }
 0x18d   :  { %162 = vpush %v123_v47 }
 0x1be   :  { %s163_s18 = spop %162 }
 0x1bf   :  { %s132_s19 = smul.f32 0.0625, %s163_s18 }
 0x1c1   :  { %134 = sst [smem:[#allocation3]] %s132_s19 }
 0x1c2   :  { %143 = dma.smem_to_hbm %s193_s20, 16, %s141_s17, [#allocation4]  }
 0x1c3   :  { %189 = dma.done.wait [#allocation4], 16  }
 0x1c4   :  { %190 = vsyncadd [#allocation4], 4294967280 }
 0x1c5   :  { %148 = sfence }
 0x1c6   :  { %149 = vsyncpa [#allocation4], 1 }

</bundles_post_ra>
